<compile_context>
chip_gen: v5e
topology: v5e:2x2
jax: 0.10.0
libtpu: 0.0.40
codegen_flags: <defaults>
</compile_context>

<pallas_src>
import functools

import jax
import jax.numpy as jnp
import numpy as np
from jax.experimental import pallas as pl
from jax.experimental.pallas import tpu as pltpu

_MiB = 1024 * 1024


def _vmem_budget_and_limit():
    """Generation-aware VMEM sizing (v7x: 64 MiB/TC, v5e/v6e: 128 MiB)."""
    cap = 64 * _MiB  # conservative default (v7x per-TC capacity)
    try:
        info = pltpu.get_tpu_info()
        cap = int(getattr(info, "vmem_capacity_bytes", cap)) or cap
    except Exception:  # pragma: no cover - query not available
        pass
    budget = cap // 2                              # live-tile sizing budget
    limit = min(cap - 8 * _MiB, (cap * 7) // 8)    # scoped limit < physical
    return budget, limit


def _choose_row_tile(batch, ncrops, out_dim, in_itemsize, vmem_budget,
                     max_rows=None):
    """Pick a batch-row tile tb (tb == batch, or a multiple of 8 dividing batch)."""
    # Rough live bytes per batch row: 2 inputs x double-buffered native-dtype
    # tiles + ~5 f32 (ncrops, 1, D) intermediates kept live (s_logp eliminated).
    per_row = ncrops * out_dim * (4 * in_itemsize + 5 * 4)
    cap = max(1, vmem_budget // per_row)
    if max_rows is not None:
        cap = min(cap, max_rows)
    if batch <= cap:
        return batch
    tb = (cap // 8) * 8
    while tb >= 8:
        if batch % tb == 0:
            return tb
        tb -= 8
    # Legal tiles need tb % 8 == 0 or tb == batch.  If nothing fits the soft
    # budget, fall back to whole-batch tiles; vmem_limit_bytes is sized near
    # physical capacity so this still compiles for realistic shapes.
    # TODO(synk): out_dim-axis (online-softmax) tiling for pathological shapes.
    return 8 if batch % 8 == 0 else batch


def _dino_loss_kernel(student_ref, teacher_ref, center_ref, inv_temp_ref,
                      loss_ref, center_out_ref, *, inv_student_temp):
    b = pl.program_id(1)   # row-tile axis ("arbitrary"); axis 0 is per-core.

    @pl.when(b == 0)
    def _init():
        loss_ref[...] = jnp.zeros_like(loss_ref)
        center_out_ref[...] = jnp.zeros_like(center_out_ref)

    inv_teacher_temp = inv_temp_ref[0]                 # scalar from SMEM

    t = teacher_ref[...].astype(jnp.float32)           # (C, tb, D)
    s = student_ref[...].astype(jnp.float32)           # (C, tb, D)
    c = center_ref[...].astype(jnp.float32)            # (1, D)
    C, tb, D = t.shape
    lane_partial = (D % 128 == 0) and (tb % 8 == 0)

    # ---- teacher: softmax((t - center) * inv_temp, axis=-1) ----
    t_logits = (t - c) * inv_teacher_temp
    t_e = jnp.exp(t_logits - jnp.max(t_logits, axis=-1, keepdims=True))
    t_denom = jnp.sum(t_e, axis=-1, keepdims=True)     # (C, tb, 1)
    t_probs = t_e * pl.reciprocal(t_denom, approx=True)   # EUP vrcp

    # ---- student: shifted logits + log-sum-exp (log_softmax NOT materialized) --
    s_shift = s * inv_student_temp
    s_shift = s_shift - jnp.max(s_shift, axis=-1, keepdims=True)
    s_lse = jnp.log(jnp.sum(jnp.exp(s_shift), axis=-1, keepdims=True))  # (C,tb,1)

    # ---- pairwise cross term, O(C*tb*D), using sum_D(t_probs) == 1 ----
    #   sum_{iq != v} q_iq . logp_v
    #     = sum(t_tot * s_shift_tot) - sum(t_probs * s_shift) - (C-1)*sum(s_lse)
    if C > 1:
        elem = (jnp.sum(t_probs, axis=0) * jnp.sum(s_shift, axis=0)
                - jnp.sum(t_probs * s_shift, axis=0))               # (tb, D)
        lse_term = (C - 1) * jnp.sum(s_lse)
    else:
        elem = jnp.sum(t_probs * s_shift, axis=0)                   # (tb, D)
        lse_term = jnp.sum(s_lse)

    # ---- center partial: raw teacher column sums (crop reduce = leading axis,
    #      pure VPU) ----
    tsum = jnp.sum(t, axis=0)                                       # (tb, D)

    if lane_partial:
        # Loss: fold rows in groups of 8 (relayout-free reshape, VPU adds),
        # then fold D with aligned 128-wide slices (VPU adds of whole vregs).
        if tb > 8:
            elem = jnp.sum(elem.reshape(tb // 8, 8, D), axis=0)     # (8, D)
        part = elem[:, 0:128]
        for kk in range(1, D // 128):
            part = part + elem[:, kk * 128:(kk + 1) * 128]          # (8, 128)
        # Spread the (tiny) lse scalar over the slab so the wrapper's single
        # cross-lane reduce of the whole slab recovers the exact cross term.
        loss_ref[...] += part - lse_term * (1.0 / (8.0 * 128.0))
    else:
        # Small / ragged case: per-tile scalar reduce (cheap: one XLU pass on a
        # single vreg after VPU cross-vreg adds), scale so slab-sum == cross.
        loss_ref[...] += (jnp.sum(elem) - lse_term) * (1.0 / (8.0 * 128.0))

    if tb % 8 == 0:
        # (8, D) accumulator: row-group fold is pure VPU; 8->1 collapse happens
        # once in the wrapper instead of per tile on the XLU.
        center_out_ref[...] += jnp.sum(tsum.reshape(tb // 8, 8, D), axis=0)
    else:
        center_out_ref[...] += jnp.sum(tsum, axis=0, keepdims=True)


class DINOLossPallas:
    """JAX/Pallas port of DINOLoss (modality='img' path, forward only)."""

    def __init__(self, out_dim, ncrops, warmup_teacher_temp, teacher_temp,
                 warmup_teacher_temp_epochs, nepochs,
                 student_temp=0.1, center_momentum_img=0.9,
                 center_momentum_skt=0.9, max_rows_per_tile=None):
        self.out_dim = out_dim
        self.ncrops = ncrops
        self.student_temp = student_temp
        self.center_momentum_img = center_momentum_img
        self.center_momentum_skt = center_momentum_skt
        self.max_rows_per_tile = max_rows_per_tile   # testing / tuning knob
        self.vmem_budget, self.vmem_limit = _vmem_budget_and_limit()
        # Buffers, deterministically zero-initialized (as register_buffer).
        self.center_img = jnp.zeros((1, out_dim), jnp.float32)
        self.center_skt = jnp.zeros((1, out_dim), jnp.float32)
        self.teacher_temp_schedule = np.concatenate((
            np.linspace(warmup_teacher_temp, teacher_temp,
                        warmup_teacher_temp_epochs),
            np.ones(nepochs - warmup_teacher_temp_epochs) * teacher_temp,
        )).astype(np.float32)

    # ----- functional forward: jit-safe (epoch must be a Python int) ---------
    def loss_and_new_center(self, student_output, teacher_output, epoch,
                            center, center_momentum):
        N, D = student_output.shape
        assert N % self.ncrops == 0 and D == self.out_dim
        batch = N // self.ncrops
        temp = float(self.teacher_temp_schedule[epoch])

        itemsize = max(jnp.dtype(student_output.dtype).itemsize,
                       jnp.dtype(teacher_output.dtype).itemsize)
        tb = _choose_row_tile(batch, self.ncrops, D, itemsize,
                              self.vmem_budget, self.max_rows_per_tile)
        nbt = batch // tb
        # Leading "parallel" axis: sharded across TensorCores on megacore
        # chips (v7x / v4 / v5p); runs sequentially (harmless) on 1-TC chips.
        num_cores = 2 if (nbt >= 2 and nbt % 2 == 0) else 1
        nbt_per_core = nbt // num_cores
        center_rows = 8 if tb % 8 == 0 else 1

        # Free row-major reshape: crop-major / batch-minor -> (C, B, D).
        s3 = student_output.reshape(self.ncrops, batch, D)
        t3 = teacher_output.reshape(self.ncrops, batch, D)

        kernel = functools.partial(
            _dino_loss_kernel, inv_student_temp=1.0 / self.student_temp)

        in_idx = lambda c, b: (0, c * nbt_per_core + b, 0)
        in_kw = {}
        if nbt_per_core >= 4 and tb <= 16:
            # Tiny tiles (huge out_dim): deepen buffering to hide DMA latency.
            in_kw = dict(pipeline_mode=pl.Buffered(3))

        cost = pl.CostEstimate(
            flops=int(16 * N * D),
            transcendentals=int(2 * N * D),
            bytes_accessed=int(N * D * 2 * itemsize
                               + 4 * D * (1 + num_cores * center_rows)
                               + num_cores * 8 * 128 * 4),
        )

        loss_slab, center_part = pl.pallas_call(
            kernel,
            out_shape=(
                # per-core lane-dense loss partials
                jax.ShapeDtypeStruct((num_cores * 8, 128), jnp.float32),
                # per-core raw teacher column-sum partials
                jax.ShapeDtypeStruct((num_cores * center_rows, D), jnp.float32),
            ),
            grid=(num_cores, nbt_per_core),
            in_specs=[
                pl.BlockSpec((self.ncrops, tb, D), in_idx, **in_kw),   # student
                pl.BlockSpec((self.ncrops, tb, D), in_idx, **in_kw),   # teacher
                pl.BlockSpec((1, D), lambda c, b: (0, 0)),             # center
                pl.BlockSpec(memory_space=pltpu.MemorySpace.SMEM),     # inv temp
            ],
            out_specs=(
                pl.BlockSpec((8, 128), lambda c, b: (c, 0)),
                pl.BlockSpec((center_rows, D), lambda c, b: (c, 0)),
            ),
            compiler_params=pltpu.CompilerParams(
                dimension_semantics=("parallel", "arbitrary"),
                vmem_limit_bytes=self.vmem_limit,
            ),
            cost_estimate=cost,
        )(s3, t3, center, jnp.array([1.0 / temp], jnp.float32))

        # ---- wrapper-side finalize (tiny XLA ops) ----
        n_terms = self.ncrops * (self.ncrops - 1) if self.ncrops > 1 else 1
        cross_total = jnp.sum(loss_slab)
        loss = -cross_total / (batch * n_terms)

        # update_center (world_size == 1).
        col_sum = jnp.sum(center_part, axis=0, keepdims=True)       # (1, D)
        batch_center = col_sum / (self.ncrops * batch)
        new_center = (center * center_momentum
                      + batch_center * (1.0 - center_momentum))
        return loss, new_center

    # ----- stateful convenience wrapper (mirrors the nn.Module buffers) ------
    def __call__(self, student_output, teacher_output, epoch):
        # NOTE: the buffer update below is a host-side Python assignment and is
        # NOT preserved under jax.jit of __call__; jit users should call
        # loss_and_new_center() and carry the center functionally.
        loss, new_center = self.loss_and_new_center(
            student_output, teacher_output, epoch,
            self.center_img, self.center_momentum_img)
        self.center_img = new_center
        return loss


def _reference(student, teacher, center, ncrops, student_temp, teacher_temp):
    """Pure-JAX reference mirroring the PyTorch forward."""
    N, D = student.shape
    batch = N // ncrops
    s_out = (student / student_temp).reshape(ncrops, batch, D)
    t_probs = jax.nn.softmax((teacher - center) / teacher_temp, axis=-1)
    t_out = t_probs.reshape(ncrops, batch, D)
    total, n_terms = 0.0, 0
    for iq in range(ncrops):
        for v in range(ncrops):
            if v == iq and ncrops > 1:
                continue
            loss = jnp.sum(-t_out[iq] * jax.nn.log_softmax(s_out[v], axis=-1),
                           axis=-1)
            total += loss.mean()
            n_terms += 1
    return total / n_terms


if __name__ == "__main__":
    def _run_case(out_dim, ncrops, batch, max_rows_per_tile=None, seed=0):
        module = DINOLossPallas(
            out_dim=out_dim, ncrops=ncrops,
            warmup_teacher_temp=0.04, teacher_temp=0.07,
            warmup_teacher_temp_epochs=3, nepochs=10,
            student_temp=0.1, center_momentum_img=0.9,
            max_rows_per_tile=max_rows_per_tile)

        key = jax.random.PRNGKey(seed)
        k1, k2 = jax.random.split(key)
        N = ncrops * batch
        # Inputs stay in bf16 (model-native dtype); the kernel upcasts per tile.
        student = jax.random.normal(k1, (N, out_dim), jnp.float32).astype(jnp.bfloat16)
        teacher = jax.random.normal(k2, (N, out_dim), jnp.float32).astype(jnp.bfloat16)
        epoch = 1

        center_before = module.center_img
        loss = jax.block_until_ready(module(student, teacher, epoch))

        s_f32 = student.astype(jnp.float32)
        t_f32 = teacher.astype(jnp.float32)
        ref = _reference(s_f32, t_f32, center_before, ncrops,
                         module.student_temp,
                         float(module.teacher_temp_schedule[epoch]))
        # rtol sized for the approx (EUP vrcp) reciprocal in the teacher softmax;
        # real math bugs (wrong n_terms / diagonal / scaling) are orders larger.
        assert jnp.allclose(loss, ref, rtol=1e-2, atol=1e-3), (loss, ref)

        ref_center = (center_before * 0.9
                      + jnp.sum(t_f32, axis=0, keepdims=True) / N * 0.1)
        assert jnp.allclose(module.center_img, ref_center,
                            rtol=1e-4, atol=1e-5), (module.center_img, ref_center)

    # Small demo shape: whole-batch tile, scalar loss-reduction fallback path.
    _run_case(out_dim=32, ncrops=4, batch=2)
    # Lane-dense D, multi-tile two-"core" grid, 8-row center / lane-partial path.
    _run_case(out_dim=256, ncrops=2, batch=32, max_rows_per_tile=8, seed=1)

    print("KERNEL_OK")
</pallas_src>

<mosaic_0001>
module attributes {stable_mosaic.version = 11 : i64} {
  func.func @_dino_loss_kernel(%arg0: i32, %arg1: i32, %arg2: memref<4x2x32xbf16, #tpu.memory_space<vmem>>, %arg3: memref<4x2x32xbf16, #tpu.memory_space<vmem>>, %arg4: memref<1x32xf32, #tpu.memory_space<vmem>>, %arg5: memref<1xf32, #tpu.memory_space<smem>>, %arg6: memref<8x128xf32, #tpu.memory_space<vmem>>, %arg7: memref<1x32xf32, #tpu.memory_space<vmem>>) attributes {dimension_semantics = [#tpu.dimension_semantics<parallel>, #tpu.dimension_semantics<arbitrary>], iteration_bounds = array<i64: 1, 1>, scalar_prefetch = 0 : i64, scratch_operands = 0 : i64, tpu.core_type = #tpu.core_type<tc>, window_params = [{transform_indices = @transform_0, window_bounds = array<i64: 4, 2, 32>}, {transform_indices = @transform_1, window_bounds = array<i64: 4, 2, 32>}, {pipeline_mode = #tpu.pipeline_mode<synchronous>, transform_indices = @transform_2, window_bounds = array<i64: 1, 32>}, {transform_indices = @transform_3, window_bounds = array<i64: 1>}, {transform_indices = @transform_4, window_bounds = array<i64: 8, 128>}, {transform_indices = @transform_5, window_bounds = array<i64: 1, 32>}]} {
    %c0_i32 = arith.constant 0 : i32
    %0 = arith.cmpi eq, %arg1, %c0_i32 : i32
    %1 = arith.extui %0 : i1 to i32
    %c0_i32_0 = arith.constant 0 : i32
    %2 = arith.cmpi ne, %1, %c0_i32_0 : i32
    scf.if %2 {
      %cst_30 = arith.constant 0.000000e+00 : f32
      %61 = vector.broadcast %cst_30 : f32 to vector<8x128xf32>
      %c0_31 = arith.constant 0 : index
      %c0_32 = arith.constant 0 : index
      %62 = vector.load %arg6[%c0_31, %c0_32] : memref<8x128xf32, #tpu.memory_space<vmem>>, vector<8x128xf32>
      tpu.vector_store %arg6[%c0_31, %c0_32], %61 {strides = array<i32>} : memref<8x128xf32, #tpu.memory_space<vmem>>, vector<8x128xf32>,
      %cst_33 = arith.constant 0.000000e+00 : f32
      %63 = vector.broadcast %cst_33 : f32 to vector<1x32xf32>
      %c0_34 = arith.constant 0 : index
      %c0_35 = arith.constant 0 : index
      %64 = vector.load %arg7[%c0_34, %c0_35] : memref<1x32xf32, #tpu.memory_space<vmem>>, vector<1x32xf32>
      tpu.vector_store %arg7[%c0_34, %c0_35], %63 {strides = array<i32>} : memref<1x32xf32, #tpu.memory_space<vmem>>, vector<1x32xf32>,
    } else {
    }
    %c0 = arith.constant 0 : index
    %3 = memref.load %arg5[%c0] : memref<1xf32, #tpu.memory_space<smem>>
    %c0_1 = arith.constant 0 : index
    %c0_2 = arith.constant 0 : index
    %c0_3 = arith.constant 0 : index
    %4 = vector.load %arg3[%c0_1, %c0_2, %c0_3] : memref<4x2x32xbf16, #tpu.memory_space<vmem>>, vector<4x2x32xbf16>
    %5 = arith.extf %4 : vector<4x2x32xbf16> to vector<4x2x32xf32>
    %c0_4 = arith.constant 0 : index
    %c0_5 = arith.constant 0 : index
    %c0_6 = arith.constant 0 : index
    %6 = vector.load %arg2[%c0_4, %c0_5, %c0_6] : memref<4x2x32xbf16, #tpu.memory_space<vmem>>, vector<4x2x32xbf16>
    %7 = arith.extf %6 : vector<4x2x32xbf16> to vector<4x2x32xf32>
    %c0_7 = arith.constant 0 : index
    %c0_8 = arith.constant 0 : index
    %8 = vector.load %arg4[%c0_7, %c0_8] : memref<1x32xf32, #tpu.memory_space<vmem>>, vector<1x32xf32>
    %9 = vector.shape_cast %8 : vector<1x32xf32> to vector<1x1x32xf32>
    %10 = vector.broadcast %9 : vector<1x1x32xf32> to vector<4x2x32xf32>
    %11 = arith.subf %5, %10 : vector<4x2x32xf32>
    %12 = vector.broadcast %3 : f32 to vector<4x2x32xf32>
    %13 = arith.mulf %11, %12 : vector<4x2x32xf32>
    %cst = arith.constant dense<0xFF800000> : vector<4x2xf32>
    %14 = vector.multi_reduction <maximumf>, %13, %cst [2] : vector<4x2x32xf32> to vector<4x2xf32>
    %15 = vector.shape_cast %14 : vector<4x2xf32> to vector<4x2x1xf32>
    %16 = vector.broadcast %15 : vector<4x2x1xf32> to vector<4x2x32xf32>
    %17 = arith.subf %13, %16 : vector<4x2x32xf32>
    %18 = math.exp %17 : vector<4x2x32xf32>
    %cst_9 = arith.constant dense<0.000000e+00> : vector<4x2xf32>
    %19 = vector.multi_reduction <add>, %18, %cst_9 [2] : vector<4x2x32xf32> to vector<4x2xf32>
    %20 = vector.shape_cast %19 : vector<4x2xf32> to vector<4x2x1xf32>
    %21 = tpu.reciprocal %20 {approx = true} : vector<4x2x1xf32> -> vector<4x2x1xf32>
    %22 = vector.broadcast %21 : vector<4x2x1xf32> to vector<4x2x32xf32>
    %23 = arith.mulf %18, %22 : vector<4x2x32xf32>
    %cst_10 = arith.constant 1.000000e+01 : f32
    %24 = vector.broadcast %cst_10 : f32 to vector<4x2x32xf32>
    %25 = arith.mulf %7, %24 : vector<4x2x32xf32>
    %cst_11 = arith.constant dense<0xFF800000> : vector<4x2xf32>
    %26 = vector.multi_reduction <maximumf>, %25, %cst_11 [2] : vector<4x2x32xf32> to vector<4x2xf32>
    %27 = vector.shape_cast %26 : vector<4x2xf32> to vector<4x2x1xf32>
    %28 = vector.broadcast %27 : vector<4x2x1xf32> to vector<4x2x32xf32>
    %29 = arith.subf %25, %28 : vector<4x2x32xf32>
    %30 = math.exp %29 : vector<4x2x32xf32>
    %cst_12 = arith.constant dense<0.000000e+00> : vector<4x2xf32>
    %31 = vector.multi_reduction <add>, %30, %cst_12 [2] : vector<4x2x32xf32> to vector<4x2xf32>
    %32 = vector.shape_cast %31 : vector<4x2xf32> to vector<4x2x1xf32>
    %33 = math.log %32 : vector<4x2x1xf32>
    %cst_13 = arith.constant dense<0.000000e+00> : vector<2x32xf32>
    %34 = vector.multi_reduction <add>, %23, %cst_13 [0] : vector<4x2x32xf32> to vector<2x32xf32>
    %cst_14 = arith.constant dense<0.000000e+00> : vector<2x32xf32>
    %35 = vector.multi_reduction <add>, %29, %cst_14 [0] : vector<4x2x32xf32> to vector<2x32xf32>
    %36 = arith.mulf %34, %35 : vector<2x32xf32>
    %37 = arith.mulf %23, %29 : vector<4x2x32xf32>
    %cst_15 = arith.constant dense<0.000000e+00> : vector<2x32xf32>
    %38 = vector.multi_reduction <add>, %37, %cst_15 [0] : vector<4x2x32xf32> to vector<2x32xf32>
    %39 = arith.subf %36, %38 : vector<2x32xf32>
    %40 = vector.shape_cast %33 : vector<4x2x1xf32> to vector<1x4x2x1xf32>
    %cst_16 = arith.constant dense<0.000000e+00> : vector<1xf32>
    %41 = vector.multi_reduction <add>, %40, %cst_16 [1, 2, 3] : vector<1x4x2x1xf32> to vector<1xf32>
    %42 = vector.shape_cast %41 : vector<1xf32> to vector<1x1x1x1xf32>
    %43 = vector.extract %42[0, 0, 0, 0] : f32 from vector<1x1x1x1xf32>
    %cst_17 = arith.constant 3.000000e+00 : f32
    %44 = arith.mulf %cst_17, %43 : f32
    %cst_18 = arith.constant dense<0.000000e+00> : vector<2x32xf32>
    %45 = vector.multi_reduction <add>, %5, %cst_18 [0] : vector<4x2x32xf32> to vector<2x32xf32>
    %c0_19 = arith.constant 0 : index
    %c0_20 = arith.constant 0 : index
    %46 = vector.load %arg6[%c0_19, %c0_20] : memref<8x128xf32, #tpu.memory_space<vmem>>, vector<8x128xf32>
    %47 = vector.shape_cast %39 : vector<2x32xf32> to vector<1x2x32xf32>
    %cst_21 = arith.constant dense<0.000000e+00> : vector<1xf32>
    %48 = vector.multi_reduction <add>, %47, %cst_21 [1, 2] : vector<1x2x32xf32> to vector<1xf32>
    %49 = vector.shape_cast %48 : vector<1xf32> to vector<1x1x1xf32>
    %50 = vector.extract %49[0, 0, 0] : f32 from vector<1x1x1xf32>
    %51 = arith.subf %50, %44 : f32
    %cst_22 = arith.constant 9.765625E-4 : f32
    %52 = arith.mulf %51, %cst_22 : f32
    %53 = vector.broadcast %52 : f32 to vector<8x128xf32>
    %54 = arith.addf %46, %53 : vector<8x128xf32>
    %c0_23 = arith.constant 0 : index
    %c0_24 = arith.constant 0 : index
    %55 = vector.load %arg6[%c0_23, %c0_24] : memref<8x128xf32, #tpu.memory_space<vmem>>, vector<8x128xf32>
    tpu.vector_store %arg6[%c0_23, %c0_24], %54 {strides = array<i32>} : memref<8x128xf32, #tpu.memory_space<vmem>>, vector<8x128xf32>,
    %c0_25 = arith.constant 0 : index
    %c0_26 = arith.constant 0 : index
    %56 = vector.load %arg7[%c0_25, %c0_26] : memref<1x32xf32, #tpu.memory_space<vmem>>, vector<1x32xf32>
    %cst_27 = arith.constant dense<0.000000e+00> : vector<32xf32>
    %57 = vector.multi_reduction <add>, %45, %cst_27 [0] : vector<2x32xf32> to vector<32xf32>
    %58 = vector.shape_cast %57 : vector<32xf32> to vector<1x32xf32>
    %59 = arith.addf %56, %58 : vector<1x32xf32>
    %c0_28 = arith.constant 0 : index
    %c0_29 = arith.constant 0 : index
    %60 = vector.load %arg7[%c0_28, %c0_29] : memref<1x32xf32, #tpu.memory_space<vmem>>, vector<1x32xf32>
    tpu.vector_store %arg7[%c0_28, %c0_29], %59 {strides = array<i32>} : memref<1x32xf32, #tpu.memory_space<vmem>>, vector<1x32xf32>,
    return
  }
  func.func @transform_0(%arg0: i32, %arg1: i32) -> (i32, i32, i32) {
    %c1_i32 = arith.constant 1 : i32
    %0 = arith.muli %arg0, %c1_i32 : i32
    %1 = arith.addi %0, %arg1 : i32
    %c0_i32 = arith.constant 0 : i32
    %c0_i32_0 = arith.constant 0 : i32
    %c0_i32_1 = arith.constant 0 : i32
    return %c0_i32, %1, %c0_i32_0 : i32, i32, i32
  }
  func.func @transform_1(%arg0: i32, %arg1: i32) -> (i32, i32, i32) {
    %c1_i32 = arith.constant 1 : i32
    %0 = arith.muli %arg0, %c1_i32 : i32
    %1 = arith.addi %0, %arg1 : i32
    %c0_i32 = arith.constant 0 : i32
    %c0_i32_0 = arith.constant 0 : i32
    %c0_i32_1 = arith.constant 0 : i32
    return %c0_i32, %1, %c0_i32_0 : i32, i32, i32
  }
  func.func @transform_2(%arg0: i32, %arg1: i32) -> (i32, i32) {
    %c0_i32 = arith.constant 0 : i32
    %c0_i32_0 = arith.constant 0 : i32
    %c0_i32_1 = arith.constant 0 : i32
    return %c0_i32, %c0_i32_0 : i32, i32
  }
  func.func @transform_3(%arg0: i32, %arg1: i32) -> i32 {
    %c0_i32 = arith.constant 0 : i32
    %c0_i32_0 = arith.constant 0 : i32
    return %c0_i32 : i32
  }
  func.func @transform_4(%arg0: i32, %arg1: i32) -> (i32, i32) {
    %c0_i32 = arith.constant 0 : i32
    %c0_i32_0 = arith.constant 0 : i32
    return %arg0, %c0_i32 : i32, i32
  }
  func.func @transform_5(%arg0: i32, %arg1: i32) -> (i32, i32) {
    %c0_i32 = arith.constant 0 : i32
    %c0_i32_0 = arith.constant 0 : i32
    return %arg0, %c0_i32 : i32, i32
  }
}

</mosaic_0001>

<bundles_post_ra>
// kernel: tpu_custom_call.1
= control target key start
LH: loop header
LB: loop body
LE: loop exit
PB: predicated region body
PF: predicated region fallthrough
CT: control target
= control target key end

     0   :  { %12 = vsyncpa [#allocation4], 0  ;;  %s562_s0 = inlined_call_operand.hbm [shape: bf16[4,2,32], index: 0, kind: input, shape index: {}]   ;;  %s563_s1 = inlined_call_operand.hbm [shape: bf16[4,2,32], index: 1, kind: input, shape index: {}]   ;;  %s564_s2 = inlined_call_operand.vmem [shape: f32[1,32], index: 2, kind: input, shape index: {}]   ;;  %s565_s3 = inlined_call_operand.<no memory space> [shape: f32[1], index: 3, kind: input, shape index: {}]   ;;  %s566_s4 = inlined_call_operand.hbm [shape: f32[8,128], index: 4, kind: output, shape index: {0}]   ;;  %s567_s5 = inlined_call_operand.hbm [shape: f32[1,32], index: 5, kind: output, shape index: {1}]  }
   0x1   :  { %13 = vsyncpa [#allocation7], 0 }
   0x2   :  { %14 = vsyncpa [#allocation5], 0 }
   0x3   :  { %15 = vsyncpa [#allocation10], 0  ;;  %s22_s20 = sshll.u32 %s562_s0, 4  ;;  %s451_s21 = smov [#allocation3]   ;;  %s23_s20 = int_to_ptr.hbm [resolvable:$true] %s22_s20 }
   0x4   :  { %s24_s22 = sshll.u32 %s451_s21, 4  ;;  %s37_s25 = sshll.u32 %s563_s1, 4  ;;  %s25_s22 = int_to_ptr.vmem [resolvable:$true] %s24_s22  ;;  %s38_s25 = int_to_ptr.hbm [resolvable:$true] %s37_s25 }
   0x5   :  { %s452_s26 = smov 16   ;;  %s453_s27 = smov 1  }
   0x6   :  { %30 = dma.hbm_to_vmem [thread:$0]  %s23_s20, 64, %s25_s22, [#allocation4], %s452_s26, %s452_s26, %s453_s27  }
   0x7   :  { %s454_s28 = smov [#allocation6]  }
   0x8   :  { %s39_s29 = sshll.u32 %s454_s28, 4  ;;  %s40_s29 = int_to_ptr.vmem [resolvable:$true] %s39_s29 }
   0x9   :  { %45 = dma.hbm_to_vmem [thread:$0]  %s38_s25, 64, %s40_s29, [#allocation7], %s452_s26, %s452_s26, %s453_s27  }
   0xa   :  { %443 = dma.done.wait [#allocation4], 64  }
   0xb   :  { %444 = vsyncadd [#allocation4], 4294967232 }
   0xc   :  { %445 = dma.done.wait [#allocation7], 64  }
   0xd   :  { %446 = vsyncadd [#allocation7], 4294967232  ;;  %v76_v0 = vld [vmem:[#allocation3] sm:$0x1]  ;;  %v77_v1 = vld [vmem:[#allocation3 + $0x1] sm:$0x1]  ;;  %v92_v8 = vstv %s565_s3 }
   0xe   :  { %v68_v2 = vld [vmem:[#allocation6] sm:$0x1]  ;;  %v80_v3 = vunpack.c.l.bf16 %v76_v0  ;;  %v81_v4 = vunpack.c.l.bf16 %v77_v1  ;;  %v314_v6 = vld [vmem:[%s564_s2] ss:$0 sm:$0xff]  ;;  %v70_v7 = vld [vmem:[#allocation6 + $0x2] sm:$0x1] }
   0xf   :  { %v72_v5 = vunpack.c.l.bf16 %v68_v2  ;;  %vm97_vm0 = vcmask 254976   ;;  %v74_v9 = vunpack.c.l.bf16 %v70_v7  ;;  %v69_v10 = vld [vmem:[#allocation6 + $0x1] sm:$0x1]  ;;  %v71_v11 = vld [vmem:[#allocation6 + $0x3] sm:$0x1]  ;;  %vm217_vm1 = vcmask 1024  }
  0x10   :  { %v142_v12 = vmul.f32 10.0, %v80_v3  ;;  %v143_v13 = vmul.f32 10.0, %v81_v4  ;;  %v73_v17 = vunpack.c.l.bf16 %v69_v10  ;;  %v75_v18 = vunpack.c.l.bf16 %v71_v11  ;;  %v79_v31 = vld [vmem:[#allocation3 + $0x3] sm:$0x1]  ;;  %v78_v34 = vld [vmem:[#allocation3 + $0x2] sm:$0x1] }
  0x11   :  { %v88_v14 = vsub.f32 %v72_v5, %v314_v6  ;;  %v235_v15 = vsel %vm97_vm0, %v72_v5, 0.0  ;;  %v90_v16 = vsub.f32 %v74_v9, %v314_v6  ;;  %v238_v22 = vsel %vm97_vm0, %v74_v9, 0.0  ;;  %s456_s2 = smov [#allocation9]   ;;  %s287_s9 = sshll.u32 %s567_s5, 4  ;;  %s288_s9 = int_to_ptr.hbm [resolvable:$true] %s287_s9 }
  0x12   :  { %v146_v19 = vsel %vm97_vm0, %v142_v12, -inf  ;;  %v149_v20 = vsel %vm97_vm0, %v143_v13, -inf  ;;  %v89_v23 = vsub.f32 %v73_v17, %v314_v6  ;;  %v236_v24 = vsel %vm97_vm0, %v73_v17, 0.0  ;;  %s285_s3 = sshll.u32 %s456_s2, 4  ;;  %s457_s14 = smov [#allocation8]   ;;  %s286_s3 = int_to_ptr.vmem [resolvable:$true] %s285_s3 }
  0x13   :  { %v93_v21 = vmul.f32 %v92_v8, %v88_v14  ;;  %147 = vmax.xlane.f32.xlu1 %v146_v19  ;;  %150 = vmax.xlane.f32.xlu2 %v149_v20  ;;  %v91_v25 = vsub.f32 %v75_v18, %v314_v6  ;;  %v95_v27 = vmul.f32 %v92_v8, %v90_v16  ;;  %v240_v30 = vsel %vm97_vm0, %v75_v18, 0.0  ;;  %s274_s15 = sshll.u32 %s457_s14, 4  ;;  %s276_s19 = sshll.u32 %s566_s4, 4  ;;  %s275_s15 = int_to_ptr.vmem [resolvable:$true] %s274_s15  ;;  %s277_s19 = int_to_ptr.hbm [resolvable:$true] %s276_s19 }
  0x14   :  { %v237_v28 = vadd.f32 %v236_v24, %v235_v15  ;;  %v94_v32 = vmul.f32 %v92_v8, %v89_v23  ;;  %v83_v38 = vunpack.c.l.bf16 %v79_v31  ;;  %v82_v40 = vunpack.c.l.bf16 %v78_v34 }
  0x15   :  { %v98_v26 = vsel %vm97_vm0, %v93_v21, -inf  ;;  %v96_v29 = vmul.f32 %v92_v8, %v91_v25  ;;  %v104_v35 = vsel %vm97_vm0, %v95_v27, -inf  ;;  %vm65_vm2 = vcmask 253952  }
  0x16   :  { %99 = vmax.xlane.f32.xlu0 %v98_v26  ;;  %v239_v33 = vadd.f32 %v238_v22, %v237_v28  ;;  %v101_v39 = vsel %vm97_vm0, %v94_v32, -inf  ;;  %v145_v41 = vmul.f32 10.0, %v83_v38  ;;  %v144_v42 = vmul.f32 10.0, %v82_v40 }
  0x17   :  { %v107_v36 = vsel %vm97_vm0, %v96_v29, -inf }
  0x18   :  { %v509_v37 = vadd.f32 %v240_v30, %v239_v33  ;;  %v155_v43 = vsel %vm97_vm0, %v145_v41, -inf  ;;  %v152_v44 = vsel %vm97_vm0, %v144_v42, -inf }
  0x1b   :  { %105 = vmax.xlane.f32.xlu1 %v104_v35  ;;  %108 = vmax.xlane.f32.xlu2 %v107_v36 }
  0x1e   :  { %102 = vmax.xlane.f32.xlu0 %v101_v39 }
  0x23   :  { %156 = vmax.xlane.f32.xlu1 %v155_v43 }
  0x26   :  { %153 = vmax.xlane.f32.xlu0 %v152_v44 }
  0x86   :  { %v148_v45 = vpop.xlane.xlu1 %147  ;;  %v151_v46 = vpop.xlane.xlu2 %150 }
  0x87   :  { %v514_v47 = vsub.f32 %v142_v12, %v148_v45  ;;  %v516_v48 = vsub.f32 %v143_v13, %v151_v46 }
  0x89   :  { %v100_v49 = vpop.xlane.xlu0 %99  ;;  %v162_v50 = vmul.f32 1.442695, %v514_v47  ;;  %v164_v51 = vmul.f32 1.442695, %v516_v48  ;;  %v198_v30 = vsel %vm97_vm0, %v516_v48, 0.0 }
  0x8a   :  { %v110_v52 = vsub.f32 %v93_v21, %v100_v49 }
  0x8b   :  { %315 = vpow2.f32 %v162_v50 }
  0x8c   :  { %317 = vpow2.f32 %v164_v51  ;;  %v114_v53 = vmul.f32 1.442695, %v110_v52 }
  0x8e   :  { %v106_v54 = vpop.xlane.xlu1 %105  ;;  %v109_v55 = vpop.xlane.xlu2 %108  ;;  %319 = vpow2.f32 %v114_v53 }
  0x8f   :  { %v112_v56 = vsub.f32 %v95_v27, %v106_v54  ;;  %v113_v57 = vsub.f32 %v96_v29, %v109_v55  ;;  %v197_v29 = vsel %vm97_vm0, %v514_v47, 0.0 }
  0x90   :  { %v199_v35 = vadd.f32 %v198_v30, %v197_v29 }
  0x91   :  { %v103_v58 = vpop.xlane.xlu0 %102  ;;  %v316_v59 = vpop.eup %315  ;;  %v118_v60 = vmul.f32 1.442695, %v112_v56  ;;  %v120_v2 = vmul.f32 1.442695, %v113_v57 }
  0x92   :  { %v111_v61 = vsub.f32 %v94_v32, %v103_v58  ;;  %v318_v62 = vpop.eup %317  ;;  %v170_v63 = vsel %vm97_vm0, %v316_v59, 0.0 }
  0x93   :  { %321 = vpow2.f32 %v118_v60  ;;  %171 = vadd.xlane.f32.xlu2 %v170_v63  ;;  %v173_v1 = vsel %vm97_vm0, %v318_v62, 0.0 }
  0x94   :  { %v116_v0 = vmul.f32 1.442695, %v111_v61  ;;  %174 = vadd.xlane.f32.xlu0 %v173_v1  ;;  %v320_v4 = vpop.eup %319 }
  0x95   :  { %v122_v11 = vsel %vm97_vm0, %v320_v4, 0.0 }
  0x96   :  { %323 = vpow2.f32 %v116_v0  ;;  %v157_v3 = vpop.xlane.xlu1 %156 }
  0x97   :  { %325 = vpow2.f32 %v120_v2  ;;  %v522_v5 = vsub.f32 %v145_v41, %v157_v3 }
  0x99   :  { %v154_v6 = vpop.xlane.xlu0 %153  ;;  %v322_v7 = vpop.eup %321  ;;  %v168_v9 = vmul.f32 1.442695, %v522_v5  ;;  %v202_v52 = vsel %vm97_vm0, %v522_v5, 0.0 }
  0x9a   :  { %v160_v8 = vsub.f32 %v144_v42, %v154_v6  ;;  %v128_v10 = vsel %vm97_vm0, %v322_v7, 0.0 }
  0x9b   :  { %327 = vpow2.f32 %v168_v9  ;;  %129 = vadd.xlane.f32.xlu1 %v128_v10  ;;  %123 = vadd.xlane.f32.xlu2 %v122_v11 }
  0x9c   :  { %v324_v12 = vpop.eup %323  ;;  %v166_v13 = vmul.f32 1.442695, %v160_v8  ;;  %v200_v36 = vsel %vm97_vm0, %v160_v8, 0.0 }
  0x9d   :  { %v125_v14 = vsel %vm97_vm0, %v324_v12, 0.0  ;;  %v326_v15 = vpop.eup %325  ;;  %v201_v50 = vadd.f32 %v200_v36, %v199_v35  ;;  %v455_v36 = vmov 0.0  }
  0x9e   :  { %329 = vpow2.f32 %v166_v13  ;;  %126 = vadd.xlane.f32.xlu0 %v125_v14  ;;  %v131_v16 = vsel %vm97_vm0, %v326_v15, 0.0  ;;  %66 = vst.msk [vmem:[#allocation9] sm:$0x1] %vm65_vm2, %v455_v36 }
  0x9f   :  { %v203_v61 = vadd.f32 %v202_v52, %v201_v50 }
  0xa1   :  { %v328_v17 = vpop.eup %327 }
  0xa2   :  { %v179_v18 = vsel %vm97_vm0, %v328_v17, 0.0 }
  0xa3   :  { %132 = vadd.xlane.f32.xlu1 %v131_v16 }
  0xa4   :  { %v330_v19 = vpop.eup %329 }
  0xa5   :  { %v176_v20 = vsel %vm97_vm0, %v330_v19, 0.0 }
  0xa6   :  { %177 = vadd.xlane.f32.xlu2 %v176_v20  ;;  %180 = vadd.xlane.f32.xlu0 %v179_v18 }
 0x106   :  { %v172_v21 = vpop.xlane.xlu2 %171 }
 0x107   :  { %v175_v22 = vpop.xlane.xlu0 %174  ;;  %331 = vlog2.f32 %v172_v21 }
 0x108   :  { %333 = vlog2.f32 %v175_v22 }
 0x10d   :  { %v332_v26 = vpop.eup %331 }
 0x10e   :  { %v130_v23 = vpop.xlane.xlu1 %129  ;;  %v124_v24 = vpop.xlane.xlu2 %123  ;;  %v183_v42 = vmul.f32 0.6931472, %v332_v26 }
 0x10f   :  { %335 = vrcp.f32 %v130_v23  ;;  %v334_v27 = vpop.eup %333 }
 0x110   :  { %337 = vrcp.f32 %v124_v24  ;;  %v185_v43 = vmul.f32 0.6931472, %v334_v27  ;;  %v218_v57 = vsel %vm217_vm1, %v183_v42, 0.0 }
 0x111   :  { %v127_v25 = vpop.xlane.xlu0 %126 }
 0x112   :  { %339 = vrcp.f32 %v127_v25  ;;  %v219_v58 = vsel %vm217_vm1, %v185_v43, 0.0 }
 0x115   :  { %v336_v28 = vpop.eup %335 }
 0x116   :  { %v338_v31 = vpop.eup %337  ;;  %v133_v32 = vpop.xlane.xlu1 %132  ;;  %v140_v38 = vmul.f32 %v336_v28, %v322_v7 }
 0x117   :  { %v138_v34 = vmul.f32 %v338_v31, %v320_v4  ;;  %341 = vrcp.f32 %v133_v32  ;;  %v220_v4 = vadd.f32 %v219_v58, %v218_v57  ;;  %v259_v31 = vsel %vm97_vm0, %v509_v37, 0.0 }
 0x118   :  { %v340_v33 = vpop.eup %339  ;;  %v207_v53 = vmul.f32 %v160_v8, %v140_v38  ;;  %v260_v32 = vrot.slane %v259_v31, 4 }
 0x119   :  { %v139_v39 = vmul.f32 %v340_v33, %v324_v12  ;;  %v178_v40 = vpop.xlane.xlu2 %177  ;;  %v181_v41 = vpop.xlane.xlu0 %180  ;;  %v205_v44 = vmul.f32 %v514_v47, %v138_v34  ;;  %v190_v45 = vsel %vm97_vm0, %v138_v34, 0.0 }
 0x11a   :  { %343 = vlog2.f32 %v178_v40  ;;  %v212_v3 = vsel %vm97_vm0, %v207_v53, 0.0  ;;  %v261_v33 = vadd.f32 %v260_v32, %v259_v31  ;;  %v258_v40 = vld [vmem:[#allocation9] sm:$0x1] }
 0x11b   :  { %v191_v46 = vsel %vm97_vm0, %v139_v39, 0.0  ;;  %v206_v49 = vmul.f32 %v516_v48, %v139_v39  ;;  %345 = vlog2.f32 %v181_v41  ;;  %v209_v54 = vsel %vm97_vm0, %v205_v44, 0.0 }
 0x11c   :  { %v192_v51 = vadd.f32 %v191_v46, %v190_v45  ;;  %v193_v48 = vsel %vm97_vm0, %v140_v38, 0.0  ;;  %v262_v34 = vrot.slane %v261_v33, 2 }
 0x11d   :  { %v210_v55 = vsel %vm97_vm0, %v206_v49, 0.0  ;;  %v342_v47 = vpop.eup %341 }
 0x11e   :  { %v211_v56 = vadd.f32 %v210_v55, %v209_v54  ;;  %v141_v59 = vmul.f32 %v342_v47, %v326_v15  ;;  %v194_v62 = vadd.f32 %v193_v48, %v192_v51  ;;  %v263_v35 = vadd.f32 %v262_v34, %v261_v33 }
 0x120   :  { %v344_v60 = vpop.eup %343  ;;  %v195_v1 = vsel %vm97_vm0, %v141_v59, 0.0  ;;  %v208_v2 = vmul.f32 %v522_v5, %v141_v59  ;;  %v213_v8 = vadd.f32 %v212_v3, %v211_v56  ;;  %v264_v38 = vrot.slane %v263_v35, 1 }
 0x121   :  { %v346_v63 = vpop.eup %345  ;;  %v187_v0 = vmul.f32 0.6931472, %v344_v60  ;;  %v196_v7 = vadd.f32 %v195_v1, %v194_v62 }
 0x122   :  { %v189_v6 = vmul.f32 0.6931472, %v346_v63  ;;  %v214_v10 = vsel %vm97_vm0, %v208_v2, 0.0  ;;  %v265_v39 = vadd.f32 %v264_v38, %v263_v35 }
 0x123   :  { %v221_v9 = vsel %vm217_vm1, %v187_v0, 0.0  ;;  %v204_v13 = vmul.f32 %v203_v61, %v196_v7  ;;  %v215_v14 = vadd.f32 %v214_v10, %v213_v8 }
 0x124   :  { %v222_v11 = vadd.f32 %v221_v9, %v220_v4  ;;  %v223_v12 = vsel %vm217_vm1, %v189_v6, 0.0  ;;  %v266_v41 = vadd.f32 %v265_v39, %v258_v40 }
 0x125   :  { %v216_v16 = vsub.f32 %v204_v13, %v215_v14 }
 0x126   :  { %v224_v15 = vadd.f32 %v223_v12, %v222_v11  ;;  %268 = vst.msk [vmem:[#allocation9] sm:$0x1] %vm65_vm2, %v266_v41 }
 0x127   :  { %v243_v5 = vsel %vm97_vm0, %v216_v16, 0.0  ;;  %290 = dma.vmem_to_hbm [thread:$0]  %s286_s3, 16, %s288_s9, [#allocation10]  }
 0x128   :  { %225 = vadd.xlane.f32.xlu1 %v224_v15  ;;  %244 = vadd.xlane.f32.xlu2 %v243_v5 }
 0x19b   :  { %v226_v17 = vpop.xlane.xlu1 %225  ;;  %v245_v19 = vpop.xlane.xlu2 %244 }
 0x19c   :  { %v227_v18 = vrot.slane %v226_v17, 4  ;;  %v246_v20 = vrot.slane %v245_v19, 4 }
 0x19e   :  { %v228_v21 = vadd.f32 %v227_v18, %v226_v17  ;;  %v247_v22 = vadd.f32 %v246_v20, %v245_v19 }
 0x1a0   :  { %v229_v23 = vrot.slane %v228_v21, 2  ;;  %v248_v24 = vrot.slane %v247_v22, 2 }
 0x1a2   :  { %v230_v25 = vadd.f32 %v229_v23, %v228_v21  ;;  %v249_v26 = vadd.f32 %v248_v24, %v247_v22 }
 0x1a4   :  { %v231_v27 = vrot.slane %v230_v25, 1  ;;  %v250_v28 = vrot.slane %v249_v26, 1 }
 0x1a6   :  { %v232_v29 = vadd.f32 %v231_v27, %v230_v25  ;;  %v251_v30 = vadd.f32 %v250_v28, %v249_v26 }
 0x1a8   :  { %303 = vpush %v232_v29 }
 0x1a9   :  { %305 = vpush %v251_v30 }
 0x1d9   :  { %s304_s10 = spop %303 }
 0x1da   :  { %s234_s11 = smul.f32 3.0, %s304_s10  ;;  %s306_s12 = spop %305 }
 0x1dc   :  { %s253_s13 = ssub.f32 %s306_s12, %s234_s11 }
 0x1de   :  { %s254_s16 = smul.f32 0.0009765625, %s253_s13 }
 0x1e0   :  { %v255_v37 = vstv %s254_s16 }
 0x1e1   :  { %257 = vst [vmem:[#allocation8] sm:$0xff] %v255_v37 }
 0x1e2   :  { %279 = dma.vmem_to_hbm [thread:$0]  %s275_s15, 128, %s277_s19, [#allocation5]  }
 0x1e3   :  { %447 = dma.done.wait [#allocation5], 128  }
 0x1e4   :  { %448 = vsyncadd [#allocation5], 4294967168 }
 0x1e5   :  { %449 = dma.done.wait [#allocation10], 16  }
 0x1e6   :  { %450 = vsyncadd [#allocation10], 4294967280 }
 0x1e7   :  { %299 = vsyncpa [#allocation4], 1 }
 0x1e8   :  { %300 = vsyncpa [#allocation7], 1 }
 0x1e9   :  { %301 = vsyncpa [#allocation5], 1 }
 0x1ea   :  { %302 = vsyncpa [#allocation10], 1 }

</bundles_post_ra>
